<compile_context>
chip_gen: v7x
topology: tpu7x:2x2x1
jax: 0.10.0
libtpu: 0.0.40
codegen_flags: <defaults>
</compile_context>

<pallas_src>
import functools

import jax
import jax.numpy as jnp
from jax.experimental import pallas as pl
from jax.experimental.pallas import tpu as pltpu

BN_EPS = 1e-5
LANE = 128
SUBLANE = 8


def _round_up(n, m):
    return ((n + m - 1) // m) * m


def _pad_cols(a, n):
    pad = n - a.shape[-1]
    return a if pad == 0 else jnp.pad(a, ((0, 0), (0, pad)))


def _pad_rows(a, n):
    pad = n - a.shape[0]
    return a if pad == 0 else jnp.pad(a, ((0, pad), (0, 0)))


def _bn_scale_shift(h, gamma, beta, inv_b):
    """BatchNorm1d training-mode as a one-pass scale/shift.

    Assumes any padded batch rows of `h` are exactly zero, so sums over all
    rows equal sums over the real rows; divides by the REAL batch size.
      mu  = sum(h)*inv_b, msq = sum(h*h)*inv_b, var = max(msq - mu^2, 0)
      out = h * (gamma * rsqrt(var+eps)) + (beta - mu * gamma * rsqrt(var+eps))
    """
    mu = jnp.sum(h, axis=0, keepdims=True) * inv_b
    msq = jnp.sum(h * h, axis=0, keepdims=True) * inv_b
    var = jnp.maximum(msq - mu * mu, 0.0)          # guard one-pass cancellation
    scale = gamma * jax.lax.rsqrt(var + BN_EPS)    # rsqrt -> EUP slot
    shift = beta - mu * scale
    return h * scale + shift


def mlp_bn_kernel(x_ref, w1_ref, gb1_ref, w2_ref, gb2_ref, w3_ref, bias3_ref,
                  o_ref, *, b_real):
    inv_b = 1.0 / b_real
    x = x_ref[...].astype(jnp.bfloat16)            # f32 -> bf16 in-kernel (VPU)

    # ---- Linear 1 (no bias) + BatchNorm1d + ReLU (+ Dropout: identity) ----
    gb1 = gb1_ref[...]
    h1 = jnp.dot(x, w1_ref[...], preferred_element_type=jnp.float32)
    h1 = jnp.maximum(_bn_scale_shift(h1, gb1[0:1, :], gb1[1:2, :], inv_b), 0.0)
    # Padded batch rows became `shift` after BN1; zero them so BN2 statistics
    # (computed over all rows, divided by b_real) stay exact.
    row_ids = jax.lax.broadcasted_iota(jnp.int32, (h1.shape[0], 1), 0)
    h1 = jnp.where(row_ids < b_real, h1, 0.0)

    # ---- Linear 2 (no bias) + BatchNorm1d + ReLU (+ Dropout: identity) ----
    gb2 = gb2_ref[...]
    h2 = jnp.dot(h1.astype(jnp.bfloat16), w2_ref[...],
                 preferred_element_type=jnp.float32)
    h2 = jnp.maximum(_bn_scale_shift(h2, gb2[0:1, :], gb2[1:2, :], inv_b), 0.0)

    # ---- Linear 3 (with bias) -> logits (padded rows/lanes sliced outside) --
    logits = jnp.dot(h2.astype(jnp.bfloat16), w3_ref[...],
                     preferred_element_type=jnp.float32)
    o_ref[...] = logits + bias3_ref[...]


def prepare_params(params):
    """One-time weight preparation (call once, reuse every forward):
    lane-pad all feature dims to multiples of 128, cast weights to bf16,
    pack (gamma, beta) pairs into single (2, Hp) arrays."""
    F, H1 = params["w1"].shape
    H2 = params["w2"].shape[1]
    C = params["w3"].shape[1]
    Fp, H1p, H2p, Cp = (_round_up(n, LANE) for n in (F, H1, H2, C))
    return {
        "w1": _pad_cols(_pad_rows(params["w1"], Fp), H1p).astype(jnp.bfloat16),
        "gb1": jnp.concatenate([_pad_cols(params["gamma1"], H1p),
                                _pad_cols(params["beta1"], H1p)], axis=0),
        "w2": _pad_cols(_pad_rows(params["w2"], H1p), H2p).astype(jnp.bfloat16),
        "gb2": jnp.concatenate([_pad_cols(params["gamma2"], H2p),
                                _pad_cols(params["beta2"], H2p)], axis=0),
        "w3": _pad_cols(_pad_rows(params["w3"], H2p), Cp).astype(jnp.bfloat16),
        "bias3": _pad_cols(params["bias3"], Cp),
    }


@functools.partial(jax.jit, static_argnames=("num_classes",))
def mlp_bn_forward(x, prepped, *, num_classes):
    """x: (B, C, H, W) float32 (NCHW, like PyTorch). Returns (B, num_classes) f32."""
    B = x.shape[0]
    x2 = x.reshape(B, -1)                            # Flatten(); stays f32

    F = x2.shape[1]
    Fp, H1p = prepped["w1"].shape
    H2p = prepped["w2"].shape[1]
    Cp = prepped["w3"].shape[1]
    Bp = _round_up(max(B, SUBLANE), SUBLANE)

    # Activation padding only (weights are already padded/cast once).
    if Fp != F:
        x2 = _pad_cols(x2, Fp)
    if Bp != B:
        x2 = _pad_rows(x2, Bp)                       # zero rows, masked in-kernel

    # Real VMEM footprint: f32 x + bf16 copy, bf16 weights, packed gb/bias,
    # f32 h1/h2 (+bf16 copies), f32 output.  2x margin, capped at 64 MiB
    # (v7x physical VMEM per TC).
    vmem_bytes = (Bp * Fp * 6
                  + Fp * H1p * 2 + H1p * H2p * 2 + H2p * Cp * 2
                  + (2 * H1p + 2 * H2p + Cp) * 4
                  + Bp * (H1p + H2p) * 6 + Bp * Cp * 4)
    vmem_limit = min(max(2 * vmem_bytes, 4 << 20), 64 << 20)

    args = (x2, prepped["w1"], prepped["gb1"], prepped["w2"], prepped["gb2"],
            prepped["w3"], prepped["bias3"])

    # No grid: single invocation, full arrays resident in VMEM (tiny at these
    # sizes; no pipeline prologue/epilogue or pointless double-buffering).
    vmem_spec = pl.BlockSpec(memory_space=pltpu.MemorySpace.VMEM)
    out_padded = pl.pallas_call(
        functools.partial(mlp_bn_kernel, b_real=B),
        out_shape=jax.ShapeDtypeStruct((Bp, Cp), jnp.float32),
        in_specs=[vmem_spec] * len(args),
        out_specs=vmem_spec,
        compiler_params=pltpu.CompilerParams(vmem_limit_bytes=vmem_limit),
    )(*args)

    return out_padded[:B, :num_classes]


def init_params(key, num_features, num_hidden_1, num_hidden_2, num_classes):
    ks = jax.random.split(key, 8)
    s1 = 1.0 / jnp.sqrt(num_features)
    s2 = 1.0 / jnp.sqrt(num_hidden_1)
    s3 = 1.0 / jnp.sqrt(num_hidden_2)
    return {
        # weights stored as (in, out) == transposed PyTorch layout
        "w1": jax.random.uniform(ks[0], (num_features, num_hidden_1),
                                 jnp.float32, -s1, s1),
        "gamma1": 1.0 + 0.1 * jax.random.normal(ks[1], (1, num_hidden_1), jnp.float32),
        "beta1": 0.1 * jax.random.normal(ks[2], (1, num_hidden_1), jnp.float32),
        "w2": jax.random.uniform(ks[3], (num_hidden_1, num_hidden_2),
                                 jnp.float32, -s2, s2),
        "gamma2": 1.0 + 0.1 * jax.random.normal(ks[4], (1, num_hidden_2), jnp.float32),
        "beta2": 0.1 * jax.random.normal(ks[5], (1, num_hidden_2), jnp.float32),
        "w3": jax.random.uniform(ks[6], (num_hidden_2, num_classes),
                                 jnp.float32, -s3, s3),
        "bias3": jax.random.uniform(ks[7], (1, num_classes),
                                    jnp.float32, -s3, s3),
    }


def reference_forward(x, params):
    """Pure-JAX reference mirroring the kernel math (bf16 matmul inputs,
    f32 accumulation, training-mode BN, identity dropout)."""
    B = x.shape[0]
    inv_b = 1.0 / B
    h = x.reshape(B, -1).astype(jnp.bfloat16)
    h = jnp.dot(h, params["w1"].astype(jnp.bfloat16),
                preferred_element_type=jnp.float32)
    h = jnp.maximum(_bn_scale_shift(h, params["gamma1"], params["beta1"], inv_b), 0.0)
    h = jnp.dot(h.astype(jnp.bfloat16), params["w2"].astype(jnp.bfloat16),
                preferred_element_type=jnp.float32)
    h = jnp.maximum(_bn_scale_shift(h, params["gamma2"], params["beta2"], inv_b), 0.0)
    return jnp.dot(h.astype(jnp.bfloat16), params["w3"].astype(jnp.bfloat16),
                   preferred_element_type=jnp.float32) + params["bias3"]


if __name__ == "__main__":
    # Small shapes consistent with the module: x is NCHW -> num_features = C*H*W.
    B, C, H, W = 2, 4, 16, 16
    num_features = C * H * W          # 1024
    num_hidden_1 = 64
    num_hidden_2 = 32
    num_classes = 10
    drop_proba = 0.5                  # dropout is identity in eval semantics

    key = jax.random.PRNGKey(0)
    kx, kp = jax.random.split(key)
    x = jax.random.normal(kx, (B, C, H, W), jnp.float32)
    params = init_params(kp, num_features, num_hidden_1, num_hidden_2, num_classes)

    # One-time weight prep (pad + bf16 cast + gamma/beta packing).
    prepped = jax.block_until_ready(prepare_params(params))

    out = jax.block_until_ready(mlp_bn_forward(x, prepped, num_classes=num_classes))
    ref = reference_forward(x, params)

    assert out.shape == (B, num_classes)
    assert jnp.allclose(out, ref, atol=1e-3, rtol=1e-3), "mismatch vs JAX reference"
    print("KERNEL_OK")
</pallas_src>

<mosaic_0001>
module attributes {stable_mosaic.version = 11 : i64} {
  func.func @mlp_bn_kernel(%arg0: memref<8x1024xf32, #tpu.memory_space<vmem>>, %arg1: memref<1024x128xbf16, #tpu.memory_space<vmem>>, %arg2: memref<2x128xf32, #tpu.memory_space<vmem>>, %arg3: memref<128x128xbf16, #tpu.memory_space<vmem>>, %arg4: memref<2x128xf32, #tpu.memory_space<vmem>>, %arg5: memref<128x128xbf16, #tpu.memory_space<vmem>>, %arg6: memref<1x128xf32, #tpu.memory_space<vmem>>, %arg7: memref<8x128xf32, #tpu.memory_space<vmem>>) attributes {dimension_semantics = [], scalar_prefetch = 0 : i64, scratch_operands = 0 : i64, tpu.core_type = #tpu.core_type<tc>} {
    %c0 = arith.constant 0 : index
    %c0_0 = arith.constant 0 : index
    %0 = vector.load %arg0[%c0, %c0_0] : memref<8x1024xf32, #tpu.memory_space<vmem>>, vector<8x1024xf32>
    %1 = arith.truncf %0 : vector<8x1024xf32> to vector<8x1024xbf16>
    %c0_1 = arith.constant 0 : index
    %c0_2 = arith.constant 0 : index
    %2 = vector.load %arg2[%c0_1, %c0_2] : memref<2x128xf32, #tpu.memory_space<vmem>>, vector<2x128xf32>
    %c0_3 = arith.constant 0 : index
    %c0_4 = arith.constant 0 : index
    %3 = vector.load %arg1[%c0_3, %c0_4] : memref<1024x128xbf16, #tpu.memory_space<vmem>>, vector<1024x128xbf16>
    %cst = arith.constant dense<0.000000e+00> : vector<8x128xf32>
    %4 = tpu.matmul %1, %3, %cst {dimension_numbers = #tpu.dot_dimension_numbers<[1], [0], [0], [1], [0, 0, 1, 1], [], []>} : vector<8x1024xbf16>, vector<1024x128xbf16>, vector<8x128xf32> -> vector<8x128xf32>
    %5 = vector.extract_strided_slice %2 {offsets = [0, 0], sizes = [1, 128], strides = [1, 1]} : vector<2x128xf32> to vector<1x128xf32>
    %6 = vector.extract_strided_slice %2 {offsets = [1, 0], sizes = [1, 128], strides = [1, 1]} : vector<2x128xf32> to vector<1x128xf32>
    %cst_5 = arith.constant dense<0.000000e+00> : vector<128xf32>
    %7 = vector.multi_reduction <add>, %4, %cst_5 [0] : vector<8x128xf32> to vector<128xf32>
    %8 = vector.shape_cast %7 : vector<128xf32> to vector<1x128xf32>
    %cst_6 = arith.constant 5.000000e-01 : f32
    %9 = vector.broadcast %cst_6 : f32 to vector<1x128xf32>
    %10 = arith.mulf %8, %9 : vector<1x128xf32>
    %11 = arith.mulf %4, %4 : vector<8x128xf32>
    %cst_7 = arith.constant dense<0.000000e+00> : vector<128xf32>
    %12 = vector.multi_reduction <add>, %11, %cst_7 [0] : vector<8x128xf32> to vector<128xf32>
    %13 = vector.shape_cast %12 : vector<128xf32> to vector<1x128xf32>
    %cst_8 = arith.constant 5.000000e-01 : f32
    %14 = vector.broadcast %cst_8 : f32 to vector<1x128xf32>
    %15 = arith.mulf %13, %14 : vector<1x128xf32>
    %16 = arith.mulf %10, %10 : vector<1x128xf32>
    %17 = arith.subf %15, %16 : vector<1x128xf32>
    %cst_9 = arith.constant 0.000000e+00 : f32
    %18 = vector.broadcast %cst_9 : f32 to vector<1x128xf32>
    %19 = arith.maximumf %17, %18 : vector<1x128xf32>
    %cst_10 = arith.constant 9.99999974E-6 : f32
    %20 = vector.broadcast %cst_10 : f32 to vector<1x128xf32>
    %21 = arith.addf %19, %20 : vector<1x128xf32>
    %22 = math.rsqrt %21 : vector<1x128xf32>
    %23 = arith.mulf %5, %22 : vector<1x128xf32>
    %24 = arith.mulf %10, %23 : vector<1x128xf32>
    %25 = arith.subf %6, %24 : vector<1x128xf32>
    %26 = vector.broadcast %23 : vector<1x128xf32> to vector<8x128xf32>
    %27 = arith.mulf %4, %26 : vector<8x128xf32>
    %28 = vector.broadcast %25 : vector<1x128xf32> to vector<8x128xf32>
    %29 = arith.addf %27, %28 : vector<8x128xf32>
    %cst_11 = arith.constant 0.000000e+00 : f32
    %30 = vector.broadcast %cst_11 : f32 to vector<8x128xf32>
    %31 = arith.maximumf %29, %30 : vector<8x128xf32>
    %32 = tpu.iota {dimensions = array<i32: 0>} : vector<8x1xi32>
    %c2_i32 = arith.constant 2 : i32
    %33 = vector.broadcast %c2_i32 : i32 to vector<8x1xi32>
    %34 = arith.cmpi slt, %32, %33 : vector<8x1xi32>
    %cst_12 = arith.constant 0.000000e+00 : f32
    %35 = vector.shape_cast %34 : vector<8x1xi1> to vector<8x1xi1>
    %36 = vector.broadcast %35 : vector<8x1xi1> to vector<8x128xi1>
    %37 = vector.broadcast %cst_12 : f32 to vector<8x128xf32>
    %38 = arith.select %36, %31, %37 : vector<8x128xi1>, vector<8x128xf32>
    %c0_13 = arith.constant 0 : index
    %c0_14 = arith.constant 0 : index
    %39 = vector.load %arg4[%c0_13, %c0_14] : memref<2x128xf32, #tpu.memory_space<vmem>>, vector<2x128xf32>
    %40 = arith.truncf %38 : vector<8x128xf32> to vector<8x128xbf16>
    %c0_15 = arith.constant 0 : index
    %c0_16 = arith.constant 0 : index
    %41 = vector.load %arg3[%c0_15, %c0_16] : memref<128x128xbf16, #tpu.memory_space<vmem>>, vector<128x128xbf16>
    %cst_17 = arith.constant dense<0.000000e+00> : vector<8x128xf32>
    %42 = tpu.matmul %40, %41, %cst_17 {dimension_numbers = #tpu.dot_dimension_numbers<[1], [0], [0], [1], [0, 0, 1, 1], [], []>} : vector<8x128xbf16>, vector<128x128xbf16>, vector<8x128xf32> -> vector<8x128xf32>
    %43 = vector.extract_strided_slice %39 {offsets = [0, 0], sizes = [1, 128], strides = [1, 1]} : vector<2x128xf32> to vector<1x128xf32>
    %44 = vector.extract_strided_slice %39 {offsets = [1, 0], sizes = [1, 128], strides = [1, 1]} : vector<2x128xf32> to vector<1x128xf32>
    %cst_18 = arith.constant dense<0.000000e+00> : vector<128xf32>
    %45 = vector.multi_reduction <add>, %42, %cst_18 [0] : vector<8x128xf32> to vector<128xf32>
    %46 = vector.shape_cast %45 : vector<128xf32> to vector<1x128xf32>
    %cst_19 = arith.constant 5.000000e-01 : f32
    %47 = vector.broadcast %cst_19 : f32 to vector<1x128xf32>
    %48 = arith.mulf %46, %47 : vector<1x128xf32>
    %49 = arith.mulf %42, %42 : vector<8x128xf32>
    %cst_20 = arith.constant dense<0.000000e+00> : vector<128xf32>
    %50 = vector.multi_reduction <add>, %49, %cst_20 [0] : vector<8x128xf32> to vector<128xf32>
    %51 = vector.shape_cast %50 : vector<128xf32> to vector<1x128xf32>
    %cst_21 = arith.constant 5.000000e-01 : f32
    %52 = vector.broadcast %cst_21 : f32 to vector<1x128xf32>
    %53 = arith.mulf %51, %52 : vector<1x128xf32>
    %54 = arith.mulf %48, %48 : vector<1x128xf32>
    %55 = arith.subf %53, %54 : vector<1x128xf32>
    %cst_22 = arith.constant 0.000000e+00 : f32
    %56 = vector.broadcast %cst_22 : f32 to vector<1x128xf32>
    %57 = arith.maximumf %55, %56 : vector<1x128xf32>
    %cst_23 = arith.constant 9.99999974E-6 : f32
    %58 = vector.broadcast %cst_23 : f32 to vector<1x128xf32>
    %59 = arith.addf %57, %58 : vector<1x128xf32>
    %60 = math.rsqrt %59 : vector<1x128xf32>
    %61 = arith.mulf %43, %60 : vector<1x128xf32>
    %62 = arith.mulf %48, %61 : vector<1x128xf32>
    %63 = arith.subf %44, %62 : vector<1x128xf32>
    %64 = vector.broadcast %61 : vector<1x128xf32> to vector<8x128xf32>
    %65 = arith.mulf %42, %64 : vector<8x128xf32>
    %66 = vector.broadcast %63 : vector<1x128xf32> to vector<8x128xf32>
    %67 = arith.addf %65, %66 : vector<8x128xf32>
    %cst_24 = arith.constant 0.000000e+00 : f32
    %68 = vector.broadcast %cst_24 : f32 to vector<8x128xf32>
    %69 = arith.maximumf %67, %68 : vector<8x128xf32>
    %70 = arith.truncf %69 : vector<8x128xf32> to vector<8x128xbf16>
    %c0_25 = arith.constant 0 : index
    %c0_26 = arith.constant 0 : index
    %71 = vector.load %arg5[%c0_25, %c0_26] : memref<128x128xbf16, #tpu.memory_space<vmem>>, vector<128x128xbf16>
    %cst_27 = arith.constant dense<0.000000e+00> : vector<8x128xf32>
    %72 = tpu.matmul %70, %71, %cst_27 {dimension_numbers = #tpu.dot_dimension_numbers<[1], [0], [0], [1], [0, 0, 1, 1], [], []>} : vector<8x128xbf16>, vector<128x128xbf16>, vector<8x128xf32> -> vector<8x128xf32>
    %c0_28 = arith.constant 0 : index
    %c0_29 = arith.constant 0 : index
    %73 = vector.load %arg6[%c0_28, %c0_29] : memref<1x128xf32, #tpu.memory_space<vmem>>, vector<1x128xf32>
    %74 = vector.broadcast %73 : vector<1x128xf32> to vector<8x128xf32>
    %75 = arith.addf %72, %74 : vector<8x128xf32>
    %c0_30 = arith.constant 0 : index
    %c0_31 = arith.constant 0 : index
    %76 = vector.load %arg7[%c0_30, %c0_31] : memref<8x128xf32, #tpu.memory_space<vmem>>, vector<8x128xf32>
    tpu.vector_store %arg7[%c0_30, %c0_31], %75 {strides = array<i32>} : memref<8x128xf32, #tpu.memory_space<vmem>>, vector<8x128xf32>,
    return
  }
}

</mosaic_0001>

<bundles_post_ra>
// kernel: mlp_bn_forward.1
= control target key start
LH: loop header
LB: loop body
LE: loop exit
PB: predicated region body
PF: predicated region fallthrough
CT: control target
= control target key end

     0   :  { %12 = vsyncpa [#allocation3], 0  ;;  %s1377_s24 = smov [#allocation2]   ;;  %s1549_s0 = inlined_call_operand.vmem [shape: f32[8,1024], index: 0, kind: input, shape index: {}]   ;;  %s1550_s1 = inlined_call_operand.hbm [shape: bf16[1024,128], index: 1, kind: input, shape index: {}]   ;;  %s1551_s2 = inlined_call_operand.vmem [shape: f32[2,128], index: 2, kind: input, shape index: {}]   ;;  %s1552_s3 = inlined_call_operand.vmem [shape: bf16[128,128], index: 3, kind: input, shape index: {}]   ;;  %s1553_s4 = inlined_call_operand.vmem [shape: f32[2,128], index: 4, kind: input, shape index: {}]   ;;  %s1554_s5 = inlined_call_operand.vmem [shape: bf16[128,128], index: 5, kind: input, shape index: {}]   ;;  %s1555_s6 = inlined_call_operand.vmem [shape: f32[1,128], index: 6, kind: input, shape index: {}]   ;;  %s1556_s7 = inlined_call_operand.vmem [shape: f32[8,128], index: 7, kind: output, shape index: {}]  }
   0x1   :  { %s20_s25 = sshll.u32 %s1377_s24, 4  ;;  %s1353_s28 = scalar_lea.hbm %s1550_s1, 8192  ;;  %s21_s25 = int_to_ptr.vmem [resolvable:$true] %s20_s25 }
   0x2   :  { %p1354_p0 = scmp.ne.s32.totalorder %s1550_s1, %s1353_s28  ;;  %p1357_p1 = scmp.lt.u32.totalorder %s1353_s28, %s1550_s1 }
   0x4   :  { %p1359_p2 = pnand %p1357_p1, %p1354_p0 }
   0x6   :  { %1362 = shalt.err (!%p1359_p2)
}
   0x7   :  { %s1363_s10 = scalar_lea.vmem %s21_s25, 8192  ;;  %p1368_p4 = scmp.lt.s32.totalorder %s21_s25, %s21_s25 }
   0x8   :  { %p1364_p3 = scmp.ne.s32.totalorder %s21_s25, %s1363_s10  ;;  %p1369_p5 = scmp.lt.s32.totalorder %s1363_s10, %s1363_s10 }
   0xa   :  { %p1370_p6 = por %p1369_p5, %p1368_p4 }
   0xc   :  { %p1371_p7 = pnand %p1370_p6, %p1364_p3 }
   0xe   :  { %1374 = shalt.err (!%p1371_p7)
}
   0xf   :  { %s1378_s11 = smov 64   ;;  %s1379_s12 = smov 4  }
  0x10   :  { %26 = dma.hbm_to_vmem [thread:$0]  %s1550_s1, 8192, %s21_s25, [#allocation3], %s1378_s11, %s1378_s11, %s1379_s12  }
  0x11   :  { %1375 = dma.done.wait [#allocation3], 8192  }
  0x12   :  { %1376 = vsyncadd [#allocation3], 4294959104  ;;  %v1269_v0 = vld [vmem:[#allocation2 + $0x40] sm:$0xff]   ;;  %v1273_v4 = vld [vmem:[#allocation2 + $0x48] sm:$0xff]   ;;  %vm1381_vm0 = vmmov 0  }
  0x13   :  { %v1270_v1 = vld [vmem:[#allocation2 + $0xc0] sm:$0xff]   ;;  %1118 = vmatprep.subr.bf16.mxu0 %v1269_v0  ;;  %v1274_v5 = vld [vmem:[#allocation2 + $0xc8] sm:$0xff]   ;;  %v1277_v8 = vld [vmem:[#allocation2 + $0x50] sm:$0xff]  }
  0x14   :  { %v1271_v2 = vld [vmem:[#allocation2] sm:$0xff]   ;;  %1140 = vmatprep.subr.bf16.mxu1 %v1270_v1  ;;  %v1275_v6 = vld [vmem:[#allocation2 + $0x8] sm:$0xff]   ;;  %v1278_v9 = vld [vmem:[#allocation2 + $0xd0] sm:$0xff]  }
  0x15   :  { %v1272_v3 = vld [vmem:[#allocation2 + $0x80] sm:$0xff]   ;;  %1119 = vmatpush3.bf16.msra.mxu0 %v1271_v2  ;;  %v1276_v7 = vld [vmem:[#allocation2 + $0x88] sm:$0xff]   ;;  %v1279_v10 = vld [vmem:[#allocation2 + $0x10] sm:$0xff]  }
  0x16   :  { %1141 = vmatpush3.bf16.msra.mxu1 %v1272_v3  ;;  %1120 = vmatprep.subr.bf16.mxu0 %v1273_v4  ;;  %v1280_v11 = vld [vmem:[#allocation2 + $0x90] sm:$0xff]   ;;  %v1281_v12 = vld [vmem:[#allocation2 + $0x58] sm:$0xff]   ;;  %v1285_v16 = vld [vmem:[#allocation2 + $0x60] sm:$0xff]  }
  0x17   :  { %1142 = vmatprep.subr.bf16.mxu1 %v1274_v5  ;;  %v1282_v13 = vld [vmem:[#allocation2 + $0xd8] sm:$0xff]   ;;  %v1286_v17 = vld [vmem:[#allocation2 + $0xe0] sm:$0xff]   ;;  %v1289_v20 = vld [vmem:[#allocation2 + $0x68] sm:$0xff]  }
  0x18   :  { %v1283_v14 = vld [vmem:[#allocation2 + $0x18] sm:$0xff]   ;;  %v1287_v18 = vld [vmem:[#allocation2 + $0x20] sm:$0xff]   ;;  %v1290_v21 = vld [vmem:[#allocation2 + $0xe8] sm:$0xff]  }
  0x19   :  { %1121 = vmatpush3.bf16.msra.mxu0 %v1275_v6  ;;  %v1284_v15 = vld [vmem:[#allocation2 + $0x98] sm:$0xff]   ;;  %v1288_v19 = vld [vmem:[#allocation2 + $0xa0] sm:$0xff]   ;;  %v1291_v22 = vld [vmem:[#allocation2 + $0x28] sm:$0xff]  }
  0x1a   :  { %1143 = vmatpush3.bf16.msra.mxu1 %v1276_v7  ;;  %1122 = vmatprep.subr.bf16.mxu0 %v1277_v8  ;;  %v1292_v23 = vld [vmem:[#allocation2 + $0xa8] sm:$0xff]   ;;  %v1293_v24 = vld [vmem:[#allocation2 + $0x70] sm:$0xff]   ;;  %v1297_v28 = vld [vmem:[#allocation2 + $0x78] sm:$0xff]  }
  0x1b   :  { %1144 = vmatprep.subr.bf16.mxu1 %v1278_v9  ;;  %v1294_v25 = vld [vmem:[#allocation2 + $0xf0] sm:$0xff]   ;;  %v1298_v29 = vld [vmem:[#allocation2 + $0xf8] sm:$0xff]   ;;  %v42_v32 = vld [vmem:[%s1549_s0 + $0x8] sm:$0xff] }
  0x1c   :  { %v1295_v26 = vld [vmem:[#allocation2 + $0x30] sm:$0xff]   ;;  %v1299_v30 = vld [vmem:[#allocation2 + $0x38] sm:$0xff]   ;;  %v41_v34 = vld [vmem:[%s1549_s0] sm:$0xff]  ;;  %v50_v35 = vpack.c.bf16 %v42_v32, %v42_v32 }
  0x1d   :  { %1123 = vmatpush3.bf16.msra.mxu0 %v1279_v10  ;;  %v1296_v27 = vld [vmem:[#allocation2 + $0xb0] sm:$0xff]   ;;  %v1300_v31 = vld [vmem:[#allocation2 + $0xb8] sm:$0xff]   ;;  %v49_v37 = vpack.c.bf16 %v41_v34, %v41_v34  ;;  %v1301_v40 = vld [vmem:[#allocation2 + $0x140] sm:$0xff]  }
  0x1e   :  { %1145 = vmatpush3.bf16.msra.mxu1 %v1280_v11  ;;  %1124 = vmatprep.subr.bf16.mxu0 %v1281_v12  ;;  %v44_v33 = vld [vmem:[%s1549_s0 + $0x18] sm:$0xff]  ;;  %v43_v38 = vld [vmem:[%s1549_s0 + $0x10] sm:$0xff]  ;;  %v1302_v41 = vld [vmem:[#allocation2 + $0x1c0] sm:$0xff]  }
  0x1f   :  { %1146 = vmatprep.subr.bf16.mxu1 %v1282_v13  ;;  %v52_v36 = vpack.c.bf16 %v44_v33, %v44_v33  ;;  %v51_v39 = vpack.c.bf16 %v43_v38, %v43_v38  ;;  %602 = vmatprep.mubr.bf16.mxu0 %v50_v35  ;;  %v1303_v42 = vld [vmem:[#allocation2 + $0x100] sm:$0xff]   ;;  %v1305_v44 = vld [vmem:[#allocation2 + $0x148] sm:$0xff]   ;;  %v1309_v48 = vld [vmem:[#allocation2 + $0x150] sm:$0xff]  }
  0x20   :  { %v1304_v43 = vld [vmem:[#allocation2 + $0x180] sm:$0xff]   ;;  %v1306_v45 = vld [vmem:[#allocation2 + $0x1c8] sm:$0xff]   ;;  %v1310_v49 = vld [vmem:[#allocation2 + $0x1d0] sm:$0xff]  }
  0x21   :  { %1125 = vmatpush3.bf16.msra.mxu0 %v1283_v14  ;;  %642 = vmatprep.mubr.bf16.mxu1 %v52_v36  ;;  %v1307_v46 = vld [vmem:[#allocation2 + $0x108] sm:$0xff]   ;;  %v1311_v50 = vld [vmem:[#allocation2 + $0x110] sm:$0xff]   ;;  %v1313_v52 = vld [vmem:[#allocation2 + $0x158] sm:$0xff]  }
  0x22   :  { %1147 = vmatpush3.bf16.msra.mxu1 %v1284_v15  ;;  %1126 = vmatprep.subr.bf16.mxu0 %v1285_v16  ;;  %v1308_v47 = vld [vmem:[#allocation2 + $0x188] sm:$0xff]   ;;  %v1312_v51 = vld [vmem:[#allocation2 + $0x190] sm:$0xff]   ;;  %v1314_v53 = vld [vmem:[#allocation2 + $0x1d8] sm:$0xff]  }
  0x23   :  { %1148 = vmatprep.subr.bf16.mxu1 %v1286_v17  ;;  %v1315_v54 = vld [vmem:[#allocation2 + $0x118] sm:$0xff]   ;;  %v1317_v56 = vld [vmem:[#allocation2 + $0x160] sm:$0xff]   ;;  %v1321_v60 = vld [vmem:[#allocation2 + $0x168] sm:$0xff]   ;;  %v1380_v17 = vmov 0.0  }
  0x24   :  { %v1316_v55 = vld [vmem:[#allocation2 + $0x198] sm:$0xff]   ;;  %v1318_v57 = vld [vmem:[#allocation2 + $0x1e0] sm:$0xff]   ;;  %v1322_v61 = vld [vmem:[#allocation2 + $0x1e8] sm:$0xff]  }
  0x25   :  { %1127 = vmatpush3.bf16.msra.mxu0 %v1287_v18  ;;  %v1319_v58 = vld [vmem:[#allocation2 + $0x120] sm:$0xff]   ;;  %v1323_v62 = vld [vmem:[#allocation2 + $0x128] sm:$0xff]   ;;  %v1325_v0 = vld [vmem:[#allocation2 + $0x170] sm:$0xff]  }
  0x26   :  { %1149 = vmatpush3.bf16.msra.mxu1 %v1288_v19  ;;  %1128 = vmatprep.subr.bf16.mxu0 %v1289_v20  ;;  %v1320_v59 = vld [vmem:[#allocation2 + $0x1a0] sm:$0xff]   ;;  %v1324_v63 = vld [vmem:[#allocation2 + $0x1a8] sm:$0xff]   ;;  %v1326_v1 = vld [vmem:[#allocation2 + $0x1f0] sm:$0xff]  }
  0x27   :  { %1150 = vmatprep.subr.bf16.mxu1 %v1290_v21  ;;  %v1327_v2 = vld [vmem:[#allocation2 + $0x130] sm:$0xff]   ;;  %v1329_v4 = vld [vmem:[#allocation2 + $0x178] sm:$0xff]   ;;  %v46_v8 = vld [vmem:[%s1549_s0 + $0x28] sm:$0xff] }
  0x28   :  { %v1328_v3 = vld [vmem:[#allocation2 + $0x1b0] sm:$0xff]   ;;  %v1330_v5 = vld [vmem:[#allocation2 + $0x1f8] sm:$0xff]   ;;  %v54_v10 = vpack.c.bf16 %v46_v8, %v46_v8  ;;  %v45_v12 = vld [vmem:[%s1549_s0 + $0x20] sm:$0xff] }
  0x29   :  { %1129 = vmatpush3.bf16.msra.mxu0 %v1291_v22  ;;  %v1331_v6 = vld [vmem:[#allocation2 + $0x138] sm:$0xff]   ;;  %v47_v13 = vld [vmem:[%s1549_s0 + $0x30] sm:$0xff]  ;;  %v53_v14 = vpack.c.bf16 %v45_v12, %v45_v12  ;;  %v1333_v16 = vld [vmem:[%s1552_s3] sm:$0xff]  }
  0x2a   :  { %1151 = vmatpush3.bf16.msra.mxu1 %v1292_v23  ;;  %1130 = vmatprep.subr.bf16.mxu0 %v1293_v24  ;;  %v1332_v7 = vld [vmem:[#allocation2 + $0x1b8] sm:$0xff]   ;;  %v55_v15 = vpack.c.bf16 %v47_v13, %v47_v13  ;;  %v1334_v18 = vld [vmem:[%s1552_s3 + $0x8] sm:$0xff]   ;;  %v1335_v19 = vld [vmem:[%s1552_s3 + $0x10] sm:$0xff]  }
  0x2b   :  { %1152 = vmatprep.subr.bf16.mxu1 %v1294_v25  ;;  %v48_v9 = vld [vmem:[%s1549_s0 + $0x38] sm:$0xff]  ;;  %v1337_v21 = vld [vmem:[%s1552_s3 + $0x20] sm:$0xff]   ;;  %v1338_v22 = vld [vmem:[%s1552_s3 + $0x28] sm:$0xff]  }
  0x2c   :  { %v56_v11 = vpack.c.bf16 %v48_v9, %v48_v9  ;;  %v1336_v20 = vld [vmem:[%s1552_s3 + $0x18] sm:$0xff]   ;;  %v1339_v23 = vld [vmem:[%s1552_s3 + $0x30] sm:$0xff]  }
  0x2d   :  { %1131 = vmatpush3.bf16.msra.mxu0 %v1295_v26  ;;  %v1340_v24 = vld [vmem:[%s1552_s3 + $0x38] sm:$0xff]  }
  0x2e   :  { %1153 = vmatpush3.bf16.msra.mxu1 %v1296_v27  ;;  %1132 = vmatprep.subr.bf16.mxu0 %v1297_v28 }
  0x2f   :  { %1154 = vmatprep.subr.bf16.mxu1 %v1298_v29 }
  0x31   :  { %1133 = vmatpush3.bf16.msra.mxu0 %v1299_v30 }
  0x32   :  { %1155 = vmatpush3.bf16.msra.mxu1 %v1300_v31  ;;  %1162 = vmatprep.subr.bf16.mxu0 %v1301_v40 }
  0x33   :  { %1184 = vmatprep.subr.bf16.mxu1 %v1302_v41 }
  0x34   :  { %603 = vmatmul.mubr.bf16.vlgmr.msra.gmra.mrb[0].mxu0 %v49_v37 }
  0x35   :  { %643 = vmatmul.mubr.bf16.vlgmr.msra.gmra.mrb[0].mxu1 %v51_v39  ;;  %1163 = vmatpush3.bf16.msra.mxu0 %v1303_v42 }
  0x36   :  { %1185 = vmatpush3.bf16.msra.mxu1 %v1304_v43  ;;  %1164 = vmatprep.subr.bf16.mxu0 %v1305_v44 }
  0x37   :  { %1186 = vmatprep.subr.bf16.mxu1 %v1306_v45  ;;  %682 = vmatprep.mubr.bf16.mxu0 %v54_v10 }
  0x38   :  { %722 = vmatprep.mubr.bf16.mxu1 %v56_v11 }
  0x39   :  { %1165 = vmatpush3.bf16.msra.mxu0 %v1307_v46 }
  0x3a   :  { %1187 = vmatpush3.bf16.msra.mxu1 %v1308_v47  ;;  %1166 = vmatprep.subr.bf16.mxu0 %v1309_v48 }
  0x3b   :  { %1188 = vmatprep.subr.bf16.mxu1 %v1310_v49 }
  0x3d   :  { %1167 = vmatpush3.bf16.msra.mxu0 %v1311_v50 }
  0x3e   :  { %1189 = vmatpush3.bf16.msra.mxu1 %v1312_v51  ;;  %1168 = vmatprep.subr.bf16.mxu0 %v1313_v52 }
  0x3f   :  { %1190 = vmatprep.subr.bf16.mxu1 %v1314_v53 }
  0x41   :  { %1169 = vmatpush3.bf16.msra.mxu0 %v1315_v54 }
  0x42   :  { %1191 = vmatpush3.bf16.msra.mxu1 %v1316_v55  ;;  %1170 = vmatprep.subr.bf16.mxu0 %v1317_v56 }
  0x43   :  { %1192 = vmatprep.subr.bf16.mxu1 %v1318_v57 }
  0x45   :  { %1171 = vmatpush3.bf16.msra.mxu0 %v1319_v58 }
  0x46   :  { %1193 = vmatpush3.bf16.msra.mxu1 %v1320_v59  ;;  %1172 = vmatprep.subr.bf16.mxu0 %v1321_v60 }
  0x47   :  { %1194 = vmatprep.subr.bf16.mxu1 %v1322_v61 }
  0x49   :  { %1173 = vmatpush3.bf16.msra.mxu0 %v1323_v62 }
  0x4a   :  { %1195 = vmatpush3.bf16.msra.mxu1 %v1324_v63  ;;  %1174 = vmatprep.subr.bf16.mxu0 %v1325_v0 }
  0x4b   :  { %1196 = vmatprep.subr.bf16.mxu1 %v1326_v1 }
  0x4d   :  { %1175 = vmatpush3.bf16.msra.mxu0 %v1327_v2 }
  0x4e   :  { %1197 = vmatpush3.bf16.msra.mxu1 %v1328_v3  ;;  %1176 = vmatprep.subr.bf16.mxu0 %v1329_v4  ;;  %v756_v3 = vlaneseq }
  0x4f   :  { %1198 = vmatprep.subr.bf16.mxu1 %v1330_v5  ;;  %v57_v5 = vld [vmem:[%s1551_s2] sm:$0x3] }
  0x50   :  { %v1493_v4 = vshrl.u32 %v756_v3, 7 }
  0x51   :  { %1177 = vmatpush3.bf16.msra.mxu0 %v1331_v6 }
  0x52   :  { %1199 = vmatpush3.bf16.msra.mxu1 %v1332_v7  ;;  %1224 = vmatprep.subr.bf16.mxu0 %v1380_v17  ;;  %v758_v8 = vsub.s32 0, %v1493_v4  ;;  %v763_v12 = vsub.s32 1, %v1493_v4  ;;  %vm769_vm1 = vcmp.lt.s32.totalorder %v1493_v4, 2 }
  0x53   :  { %1244 = vmatprep.subr.bf16.mxu1 %v1380_v17  ;;  %vm1106_vm2 = vmpackc.low %vm769_vm1, %vm769_vm1 }
  0x54   :  { %683 = vmatmul.mubr.bf16.vlgmr.msra.gmra.mrb[4].mxu0 %v53_v14 }
  0x55   :  { %723 = vmatmul.mubr.bf16.vlgmr.msra.gmra.mrb[4].mxu1 %v55_v15  ;;  %1225 = vmatpush3.bf16.msra.mxu0 %v1333_v16 }
  0x56   :  { %1226 = vmatprep.subr.bf16.mxu0 %v1380_v17  ;;  %1240 = vmatprep.mubr.msk.bf16.mxu0 %vm1381_vm0, %v1380_v17 }
  0x57   :  { %1260 = vmatprep.mubr.msk.bf16.mxu1 %vm1381_vm0, %v1380_v17 }
  0x59   :  { %1227 = vmatpush3.bf16.msra.mxu0 %v1334_v18 }
  0x5a   :  { %1228 = vmatprep.subr.bf16.mxu0 %v1380_v17 }
  0x5d   :  { %1229 = vmatpush3.bf16.msra.mxu0 %v1335_v19 }
  0x5e   :  { %1230 = vmatprep.subr.bf16.mxu0 %v1380_v17 }
  0x61   :  { %1231 = vmatpush3.bf16.msra.mxu0 %v1336_v20  ;;  %v1341_v20 = vld [vmem:[%s1554_s5] sm:$0xff]  }
  0x62   :  { %1232 = vmatprep.subr.bf16.mxu0 %v1380_v17  ;;  %1245 = vmatpush3.bf16.msra.mxu1 %v1341_v20 }
  0x63   :  { %1246 = vmatprep.subr.bf16.mxu1 %v1380_v17 }
  0x65   :  { %1233 = vmatpush3.bf16.msra.mxu0 %v1337_v21  ;;  %v1342_v21 = vld [vmem:[%s1554_s5 + $0x8] sm:$0xff]  }
  0x66   :  { %1234 = vmatprep.subr.bf16.mxu0 %v1380_v17  ;;  %1247 = vmatpush3.bf16.msra.mxu1 %v1342_v21 }
  0x67   :  { %1248 = vmatprep.subr.bf16.mxu1 %v1380_v17 }
  0x69   :  { %1235 = vmatpush3.bf16.msra.mxu0 %v1338_v22  ;;  %v1343_v22 = vld [vmem:[%s1554_s5 + $0x10] sm:$0xff]  }
  0x6a   :  { %1236 = vmatprep.subr.bf16.mxu0 %v1380_v17  ;;  %1249 = vmatpush3.bf16.msra.mxu1 %v1343_v22 }
  0x6b   :  { %1250 = vmatprep.subr.bf16.mxu1 %v1380_v17 }
  0x6d   :  { %1237 = vmatpush3.bf16.msra.mxu0 %v1339_v23  ;;  %v1344_v23 = vld [vmem:[%s1554_s5 + $0x18] sm:$0xff]  }
  0x6e   :  { %1238 = vmatprep.subr.bf16.mxu0 %v1380_v17  ;;  %1251 = vmatpush3.bf16.msra.mxu1 %v1344_v23 }
  0x6f   :  { %1252 = vmatprep.subr.bf16.mxu1 %v1380_v17 }
  0x71   :  { %1239 = vmatpush3.bf16.msra.mxu0 %v1340_v24  ;;  %v1345_v24 = vld [vmem:[%s1554_s5 + $0x20] sm:$0xff]  }
  0x72   :  { %1253 = vmatpush3.bf16.msra.mxu1 %v1345_v24 }
  0x73   :  { %1254 = vmatprep.subr.bf16.mxu1 %v1380_v17 }
 0x107   :  { %v1134_v25 = vpop.f32.mrb[0].mxu0 }
 0x108   :  { %v1156_v26 = vpop.f32.mrb[0].mxu1  ;;  %v1135_v27 = vpop.f32.mrb[1].mxu0 }
 0x109   :  { %v1157_v28 = vpop.f32.mrb[1].mxu1  ;;  %v1136_v29 = vadd.f32 %v1135_v27, %v1134_v25  ;;  %v1137_v31 = vpop.f32.mrb[2].mxu0  ;;  %v1346_v25 = vld [vmem:[%s1554_s5 + $0x28] sm:$0xff]   ;;  %v1348_v27 = vld [vmem:[%s1554_s5 + $0x38] sm:$0xff]  }
 0x10a   :  { %v1158_v30 = vadd.f32 %v1157_v28, %v1156_v26  ;;  %v1159_v32 = vpop.f32.mrb[2].mxu1  ;;  %v1138_v33 = vpop.f32.mrb[3].mxu0  ;;  %1255 = vmatpush3.bf16.msra.mxu1 %v1346_v25  ;;  %v1347_v26 = vld [vmem:[%s1554_s5 + $0x30] sm:$0xff]  }
 0x10b   :  { %v1160_v34 = vpop.f32.mrb[3].mxu1  ;;  %1256 = vmatprep.subr.bf16.mxu1 %v1380_v17 }
 0x10c   :  { %v645_v35 = vadd.f32 %v1158_v30, %v1136_v29 }
 0x10e   :  { %1257 = vmatpush3.bf16.msra.mxu1 %v1347_v26 }
 0x10f   :  { %1258 = vmatprep.subr.bf16.mxu1 %v1380_v17 }
 0x112   :  { %1259 = vmatpush3.bf16.msra.mxu1 %v1348_v27 }
 0x127   :  { %v1178_v36 = vpop.f32.mrb[4].mxu0 }
 0x128   :  { %v1200_v37 = vpop.f32.mrb[4].mxu1  ;;  %v1179_v38 = vpop.f32.mrb[5].mxu0 }
 0x129   :  { %v1180_v39 = vadd.f32 %v1179_v38, %v1178_v36  ;;  %v1201_v40 = vpop.f32.mrb[5].mxu1  ;;  %v1181_v41 = vpop.f32.mrb[6].mxu0 }
 0x12a   :  { %v1202_v42 = vadd.f32 %v1201_v40, %v1200_v37  ;;  %v1203_v43 = vpop.f32.mrb[6].mxu1  ;;  %v1182_v44 = vpop.f32.mrb[7].mxu0 }
 0x12b   :  { %v685_v45 = vadd.f32 %v1180_v39, %v645_v35  ;;  %v1204_v46 = vpop.f32.mrb[7].mxu1 }
 0x12d   :  { %v725_v47 = vadd.f32 %v1202_v42, %v685_v45 }
 0x12f   :  { %v730_v48 = vrot.slane %v725_v47, 4  ;;  %v737_v49 = vmul.f32 %v725_v47, %v725_v47 }
 0x131   :  { %v731_v50 = vadd.f32 %v730_v48, %v725_v47  ;;  %v738_v51 = vrot.slane %v737_v49, 4 }
 0x133   :  { %v732_v52 = vrot.slane %v731_v50, 2  ;;  %v739_v53 = vadd.f32 %v738_v51, %v737_v49 }
 0x135   :  { %v733_v54 = vadd.f32 %v732_v52, %v731_v50  ;;  %v740_v55 = vrot.slane %v739_v53, 2  ;;  %v773_v50 = vld [vmem:[%s1553_s4] sm:$0x3] }
 0x137   :  { %v734_v56 = vrot.slane %v733_v54, 1  ;;  %v741_v57 = vadd.f32 %v740_v55, %v739_v53 }
 0x139   :  { %v735_v58 = vadd.f32 %v734_v56, %v733_v54  ;;  %v742_v59 = vrot.slane %v741_v57, 1 }
 0x13b   :  { %v736_v60 = vmul.f32 0.5, %v735_v58  ;;  %v743_v61 = vadd.f32 %v742_v59, %v741_v57 }
 0x13d   :  { %v744_v62 = vmul.f32 0.5, %v743_v61  ;;  %v745_v63 = vmul.f32 %v736_v60, %v736_v60 }
 0x13f   :  { %v746_v0 = vsub.f32 %v744_v62, %v745_v63  ;;  %v1109_v62 = vld [vmem:[%s1555_s6] ss:$0 sm:$0xff] }
 0x141   :  { %v747_v1 = vmax.f32 %v746_v0, 0.0 }
 0x143   :  { %v748_v2 = vadd.f32 1e-05, %v747_v1 }
 0x145   :  { %1349 = vrsqrt.f32 %v748_v2 }
 0x14f   :  { %v1350_v6 = vpop.eup %1349 }
 0x150   :  { %v750_v7 = vmul.f32 %v1350_v6, %v57_v5 }
 0x152   :  { %v751_v9 = vmul.f32 %v750_v7, %v736_v60  ;;  %v759_v11 = vrot.slane %v750_v7, %v758_v8 }
 0x154   :  { %v753_v10 = vrot.slane %v751_v9, 7  ;;  %v760_v14 = vmul.f32 %v759_v11, %v725_v47 }
 0x156   :  { %v755_v13 = vsub.f32 %v57_v5, %v753_v10 }
 0x158   :  { %v764_v15 = vrot.slane %v755_v13, %v763_v12 }
 0x15a   :  { %v765_v16 = vadd.f32 %v764_v15, %v760_v14 }
 0x15c   :  { %v766_v18 = vmax.f32 %v765_v16, 0.0 }
 0x15e   :  { %v1107_v19 = vpack.c.bf16 %v766_v18, %v766_v18 }
 0x160   :  { %1241 = vmatmul.mubr.msk.bf16.vlgmr.msra.gmra.mrb[8].mxu0 %vm1106_vm2, %v1107_v19 }
 0x233   :  { %v873_v28 = vpop.f32.mrb[8].mxu0 }
 0x234   :  { %v879_v29 = vrot.slane %v873_v28, 4  ;;  %v886_v30 = vmul.f32 %v873_v28, %v873_v28  ;;  %v1242_v31 = vpop.f32.mrb[9].mxu0 }
 0x235   :  { %v876_v32 = vpop.f32.mrb[10].mxu0 }
 0x236   :  { %v880_v33 = vadd.f32 %v879_v29, %v873_v28  ;;  %v887_v34 = vrot.slane %v886_v30, 4  ;;  %v1243_v35 = vpop.f32.mrb[11].mxu0 }
 0x238   :  { %v881_v36 = vrot.slane %v880_v33, 2  ;;  %v888_v37 = vadd.f32 %v887_v34, %v886_v30 }
 0x23a   :  { %v882_v38 = vadd.f32 %v881_v36, %v880_v33  ;;  %v889_v39 = vrot.slane %v888_v37, 2 }
 0x23c   :  { %v883_v40 = vrot.slane %v882_v38, 1  ;;  %v890_v41 = vadd.f32 %v889_v39, %v888_v37 }
 0x23e   :  { %v884_v42 = vadd.f32 %v883_v40, %v882_v38  ;;  %v891_v43 = vrot.slane %v890_v41, 1 }
 0x240   :  { %v885_v44 = vmul.f32 0.5, %v884_v42  ;;  %v892_v45 = vadd.f32 %v891_v43, %v890_v41 }
 0x242   :  { %v893_v17 = vmul.f32 0.5, %v892_v45  ;;  %v894_v46 = vmul.f32 %v885_v44, %v885_v44 }
 0x244   :  { %v895_v47 = vsub.f32 %v893_v17, %v894_v46 }
 0x246   :  { %v896_v48 = vmax.f32 %v895_v47, 0.0 }
 0x248   :  { %v897_v49 = vadd.f32 1e-05, %v896_v48 }
 0x24a   :  { %1351 = vrsqrt.f32 %v897_v49 }
 0x254   :  { %v1352_v51 = vpop.eup %1351 }
 0x255   :  { %v899_v52 = vmul.f32 %v1352_v51, %v773_v50 }
 0x257   :  { %v900_v53 = vmul.f32 %v899_v52, %v885_v44  ;;  %v908_v55 = vrot.slane %v899_v52, %v758_v8 }
 0x259   :  { %v902_v54 = vrot.slane %v900_v53, 7  ;;  %v909_v57 = vmul.f32 %v908_v55, %v873_v28 }
 0x25b   :  { %v904_v56 = vsub.f32 %v773_v50, %v902_v54 }
 0x25d   :  { %v913_v58 = vrot.slane %v904_v56, %v763_v12 }
 0x25f   :  { %v914_v59 = vadd.f32 %v913_v58, %v909_v57 }
 0x261   :  { %v915_v60 = vmax.f32 %v914_v59, 0.0 }
 0x263   :  { %v916_v61 = vpack.c.bf16 %v915_v60, %v915_v60 }
 0x265   :  { %1261 = vmatmul.mubr.bf16.vlgmr.msra.gmra.mrb[8].mxu1 %v916_v61 }
 0x338   :  { %v1022_v63 = vpop.f32.mrb[8].mxu1 }
 0x339   :  { %v1023_v0 = vadd.f32 %v1109_v62, %v1022_v63  ;;  %v1262_v1 = vpop.f32.mrb[9].mxu1 }
 0x33a   :  { %v1025_v2 = vpop.f32.mrb[10].mxu1 }
 0x33b   :  { %1028 = vst [vmem:[%s1556_s7] sm:$0xff] %v1023_v0  ;;  %v1263_v3 = vpop.f32.mrb[11].mxu1 }
 0x33c   :  { %1033 = vsyncpa [#allocation3], 1 }

</bundles_post_ra>
